<compile_context>
chip_gen: v6e
topology: v6e:2x2x1
jax: 0.10.0
libtpu: 0.0.40
codegen_flags: <defaults>
</compile_context>

<pallas_src>
import jax
import jax.numpy as jnp
from jax.experimental import pallas as pl
from jax.experimental.pallas import tpu as pltpu

_PARTIAL_ROWS = 8
_PARTIAL_LANES = 128
_NEG_PAD = -1e30        # pad value for BOTH tensors: ~0 softmax weight, 0 KL for pad rows
_F32_TEMPS = 6          # full-tile f32 temporaries the body materializes (s, t, e_s,
                        # e_t, (t-s), e_t*(t-s)) -- counted in the VMEM budget


def _make_kd_kernel(inv_t, use_mxu_reductions):
    """Row-tiled / class-chunked KD partial-sum kernel (online softmax over C)."""

    def lane_sum(x):
        if use_mxu_reductions:
            # v7x: body is VALU-bound -> push the lane reductions onto the idle MXU
            # via a ones column.  Default matmul precision; switch to
            # precision=lax.Precision.HIGHEST if tighter parity is ever required.
            ones_col = jnp.ones((x.shape[-1], 1), dtype=jnp.float32)
            return jax.lax.dot_general(
                x, ones_col, (((1,), (0,)), ((), ())),
                preferred_element_type=jnp.float32)
        return jnp.sum(x, axis=-1, keepdims=True)

    def kernel(stu_ref, tea_ref, out_ref,
               m_s_ref, l_s_ref, m_t_ref, l_t_ref, d_ref):
        ci = pl.program_id(1)

        @pl.when(ci == 0)
        def _():
            m_s_ref[...] = jnp.full_like(m_s_ref, -jnp.inf)
            m_t_ref[...] = jnp.full_like(m_t_ref, -jnp.inf)
            l_s_ref[...] = jnp.zeros_like(l_s_ref)
            l_t_ref[...] = jnp.zeros_like(l_t_ref)
            d_ref[...] = jnp.zeros_like(d_ref)

        s = stu_ref[...].astype(jnp.float32) * inv_t       # student logits / T
        t = tea_ref[...].astype(jnp.float32) * inv_t       # teacher logits / T

        # Student running log-sum-exp.
        m_s_old = m_s_ref[...]
        m_s_new = jnp.maximum(m_s_old, jnp.max(s, axis=-1, keepdims=True))
        l_s_ref[...] = (jnp.exp(m_s_old - m_s_new) * l_s_ref[...]
                        + lane_sum(jnp.exp(s - m_s_new)))
        m_s_ref[...] = m_s_new

        # Teacher running log-sum-exp + running dot  sum_c e_t * (t - s)
        # ((t - s) is shift-invariant -> only the alpha_t rescale is needed).
        m_t_old = m_t_ref[...]
        m_t_new = jnp.maximum(m_t_old, jnp.max(t, axis=-1, keepdims=True))
        alpha_t = jnp.exp(m_t_old - m_t_new)
        e_t = jnp.exp(t - m_t_new)
        l_t_ref[...] = alpha_t * l_t_ref[...] + lane_sum(e_t)
        d_ref[...] = alpha_t * d_ref[...] + lane_sum(e_t * (t - s))
        m_t_ref[...] = m_t_new

        @pl.when(ci == pl.num_programs(1) - 1)
        def _():
            # KL_row = d / l_t + lse(s) - lse(t)     (per-row work only)
            l_t = l_t_ref[...]
            kl = (d_ref[...] * pl.reciprocal(l_t, approx=False)
                  + (m_s_ref[...] + jnp.log(l_s_ref[...]))
                  - (m_t_ref[...] + jnp.log(l_t)))
            tile_sum = jnp.sum(kl, axis=0, keepdims=True)          # (1, 1)
            # Lane-dense (8,128) block: tile sum in [0,0], zeros elsewhere, so the
            # wrapper combine is a single dense jnp.sum (no strided gather).
            rows_i = jax.lax.broadcasted_iota(jnp.int32, out_ref.shape, 0)
            cols_i = jax.lax.broadcasted_iota(jnp.int32, out_ref.shape, 1)
            out_ref[...] = jnp.where((rows_i == 0) & (cols_i == 0), tile_sum, 0.0)

    return kernel


def _round_up(x, m):
    return (x + m - 1) // m * m


def _vmem_capacity_bytes():
    # Generation-aware budgets: v5e/v6e have 128 MiB VMEM, v7x has 64 MiB per TC.
    try:
        cap = getattr(pltpu.get_tpu_info(), "vmem_capacity_bytes", None)
        if cap:
            return int(cap)
    except Exception:
        pass
    return 64 << 20       # conservative fallback: assume the smallest generation


def _choose_tiles(n, c, itemsize, vmem_cap, block_rows, block_c):
    small_vmem = vmem_cap <= (64 << 20) + (1 << 20)      # v7x-like (64 MiB / TC)
    # Per-grid-step working set: 2 inputs x 2 pipeline buffers PLUS the full-tile
    # f32 temporaries (counted via _F32_TEMPS); budget leaves headroom for partial
    # output buffers, scratch accumulators and internal scratch.
    budget = (24 << 20) if small_vmem else (56 << 20)
    max_rows = 512 if small_vmem else 1024
    row_q = 16 if itemsize < 4 else 8                    # bf16 packs 16 sublanes
    bytes_per_elem = 2 * 2 * itemsize + _F32_TEMPS * 4

    c128 = _round_up(c, 128)
    if block_c is None:
        c_cap = 4096 if small_vmem else 8192
        if c128 <= c_cap:
            block_c = c128
        else:                      # vocab-scale C: chunk it, online softmax handles it
            n_chunks = -(-c128 // c_cap)
            block_c = _round_up(-(-c128 // n_chunks), 128)
    else:
        block_c = _round_up(min(block_c, c128), 128)
    padded_c = _round_up(c128, block_c)

    if block_rows is None:
        fit = budget // (bytes_per_elem * block_c)
        block_rows = max(row_q, (min(max_rows, fit) // row_q) * row_q)
        block_rows = min(block_rows, _round_up(n, row_q))
    else:
        block_rows = _round_up(block_rows, 8)
    padded_n = _round_up(n, block_rows)
    return block_rows, block_c, padded_n, padded_c


def distillation_loss(outputs, teacher_outputs, a, temperature=1.0, *,
                      block_rows=None, block_c=None, use_mxu_reductions=None):
    """KLDiv(batchmean)(log_softmax(out/T), softmax(teacher/T)) * a*T^2 on TPU."""
    assert outputs.shape == teacher_outputs.shape and outputs.ndim == 2
    n, c = outputs.shape
    itemsize = jnp.dtype(outputs.dtype).itemsize

    vmem_cap = _vmem_capacity_bytes()
    small_vmem = vmem_cap <= (64 << 20) + (1 << 20)
    if use_mxu_reductions is None:
        # v7x's per-TC 3.2 TB/s HBM flips this kernel VALU-bound -> offload lane
        # reductions to the MXU there; v5e/v6e stay HBM-bound, keep them on VPU.
        use_mxu_reductions = small_vmem

    block_rows, block_c, padded_n, padded_c = _choose_tiles(
        n, c, itemsize, vmem_cap, block_rows, block_c)

    if (padded_n, padded_c) != (n, c):
        # Same large-negative pad for both tensors: pad columns get ~0 softmax
        # weight; pad rows are identical student/teacher so their KL is exactly 0.
        pad = ((0, padded_n - n), (0, padded_c - c))
        outputs = jnp.pad(outputs, pad, constant_values=_NEG_PAD)
        teacher_outputs = jnp.pad(teacher_outputs, pad, constant_values=_NEG_PAD)

    num_row_tiles = padded_n // block_rows
    num_c_chunks = padded_c // block_c

    # VMEM accounting: double-buffered inputs + full-tile f32 temporaries + partial
    # output double buffer + (rows,1) scratch accumulators (lane-padded to 128).
    need = (2 * 2 * block_rows * block_c * itemsize
            + _F32_TEMPS * block_rows * block_c * 4
            + 2 * _PARTIAL_ROWS * _PARTIAL_LANES * 4
            + 5 * block_rows * 128 * 4)
    vmem_limit = int(min(max(int(need * 1.3), 16 << 20) + (2 << 20),
                         int(vmem_cap * 0.75)))

    kernel = _make_kd_kernel(1.0 / float(temperature), bool(use_mxu_reductions))

    partials = pl.pallas_call(
        kernel,
        out_shape=jax.ShapeDtypeStruct(
            (num_row_tiles * _PARTIAL_ROWS, _PARTIAL_LANES), jnp.float32),
        grid=(num_row_tiles, num_c_chunks),
        in_specs=[
            pl.BlockSpec((block_rows, block_c), lambda i, j: (i, j)),   # student
            pl.BlockSpec((block_rows, block_c), lambda i, j: (i, j)),   # teacher
        ],
        out_specs=pl.BlockSpec((_PARTIAL_ROWS, _PARTIAL_LANES), lambda i, j: (i, 0)),
        scratch_shapes=[pltpu.VMEM((block_rows, 1), jnp.float32)] * 5,
        compiler_params=pltpu.CompilerParams(
            dimension_semantics=("parallel", "arbitrary"),
            vmem_limit_bytes=vmem_limit,
        ),
    )(outputs, teacher_outputs)

    # Finalize off the vector units: GLOBAL batchmean (true N) and the a*T^2 scale.
    t_f = jnp.float32(temperature)
    scale = (jnp.float32(a) * t_f * t_f) / jnp.float32(n)
    return jnp.sum(partials) * scale


def _reference_loss(outputs, teacher_outputs, a, temperature):
    # Pure-JAX reference of the PyTorch forward.
    T = jnp.float32(temperature)
    o = outputs.astype(jnp.float32) / T
    t = teacher_outputs.astype(jnp.float32) / T
    log_p_s = jax.nn.log_softmax(o, axis=1)
    p_t = jax.nn.softmax(t, axis=1)
    log_p_t = jax.nn.log_softmax(t, axis=1)
    kl = jnp.sum(p_t * (log_p_t - log_p_s)) / outputs.shape[0]
    return kl * (a * T * T)


if __name__ == "__main__":
    key = jax.random.PRNGKey(0)
    k1, k2 = jax.random.split(key)

    N, C = 32, 384                 # small logits batch (lane-aligned class count)
    temperature, a = 2.0, 0.7

    outputs = jax.random.normal(k1, (N, C), dtype=jnp.float32)
    teacher_outputs = jax.random.normal(k2, (N, C), dtype=jnp.float32)
    ref = _reference_loss(outputs, teacher_outputs, a, temperature)

    # 1) Auto-picked tiles (single block at this size).
    loss = jax.block_until_ready(
        distillation_loss(outputs, teacher_outputs, a, temperature))
    assert jnp.allclose(loss, ref, rtol=5e-3, atol=1e-4), (loss, ref)

    # 2) Forced multi-tile grid on BOTH axes: exercises the row-parallel partial
    #    sums and the online-softmax class chunking.
    loss_t = jax.block_until_ready(distillation_loss(
        outputs, teacher_outputs, a, temperature, block_rows=16, block_c=128))
    assert jnp.allclose(loss_t, ref, rtol=5e-3, atol=1e-4), (loss_t, ref)

    # 3) Awkward (non-aligned) N and C: exercises the padding path; batchmean
    #    still divides by the TRUE batch size.
    N2, C2 = 21, 200
    o2 = jax.random.normal(jax.random.PRNGKey(1), (N2, C2), dtype=jnp.float32)
    t2 = jax.random.normal(jax.random.PRNGKey(2), (N2, C2), dtype=jnp.float32)
    ref2 = _reference_loss(o2, t2, a, temperature)
    loss2 = jax.block_until_ready(
        distillation_loss(o2, t2, a, temperature, block_c=128))
    assert jnp.allclose(loss2, ref2, rtol=5e-3, atol=1e-4), (loss2, ref2)

    # 4) bf16 logits: half the HBM traffic, math stays f32 in-kernel.
    o_bf = outputs.astype(jnp.bfloat16)
    t_bf = teacher_outputs.astype(jnp.bfloat16)
    ref_bf = _reference_loss(o_bf, t_bf, a, temperature)
    loss_bf = jax.block_until_ready(
        distillation_loss(o_bf, t_bf, a, temperature, block_rows=16))
    assert jnp.allclose(loss_bf, ref_bf, rtol=1e-2, atol=1e-3), (loss_bf, ref_bf)

    # 5) MXU-offloaded lane reductions (auto-enabled on v7x; forced on here so the
    #    path is compiled and verified on whatever chip this runs on).
    loss_mxu = jax.block_until_ready(distillation_loss(
        outputs, teacher_outputs, a, temperature, use_mxu_reductions=True))
    assert jnp.allclose(loss_mxu, ref, rtol=2e-2, atol=1e-3), (loss_mxu, ref)

    print("KERNEL_OK")
</pallas_src>

<mosaic_0001>
module attributes {stable_mosaic.version = 11 : i64} {
  func.func @kernel(%arg0: i32, %arg1: i32, %arg2: memref<32x384xf32, #tpu.memory_space<vmem>>, %arg3: memref<32x384xf32, #tpu.memory_space<vmem>>, %arg4: memref<8x128xf32, #tpu.memory_space<vmem>>, %arg5: memref<32x1xf32, #tpu.memory_space<vmem>>, %arg6: memref<32x1xf32, #tpu.memory_space<vmem>>, %arg7: memref<32x1xf32, #tpu.memory_space<vmem>>, %arg8: memref<32x1xf32, #tpu.memory_space<vmem>>, %arg9: memref<32x1xf32, #tpu.memory_space<vmem>>) attributes {dimension_semantics = [#tpu.dimension_semantics<parallel>, #tpu.dimension_semantics<arbitrary>], iteration_bounds = array<i64: 1, 1>, scalar_prefetch = 0 : i64, scratch_operands = 5 : i64, tpu.core_type = #tpu.core_type<tc>, window_params = [{transform_indices = @transform_0, window_bounds = array<i64: 32, 384>}, {transform_indices = @transform_1, window_bounds = array<i64: 32, 384>}, {transform_indices = @transform_2, window_bounds = array<i64: 8, 128>}]} {
    %c0_i32 = arith.constant 0 : i32
    %0 = arith.cmpi eq, %arg1, %c0_i32 : i32
    %1 = arith.extui %0 : i1 to i32
    %c0_i32_0 = arith.constant 0 : i32
    %2 = arith.cmpi ne, %1, %c0_i32_0 : i32
    scf.if %2 {
      %cst_35 = arith.constant 0xFF800000 : f32
      %52 = vector.broadcast %cst_35 : f32 to vector<32x1xf32>
      %c0_36 = arith.constant 0 : index
      %c0_37 = arith.constant 0 : index
      %53 = vector.load %arg5[%c0_36, %c0_37] : memref<32x1xf32, #tpu.memory_space<vmem>>, vector<32x1xf32>
      tpu.vector_store %arg5[%c0_36, %c0_37], %52 {strides = array<i32>} : memref<32x1xf32, #tpu.memory_space<vmem>>, vector<32x1xf32>,
      %cst_38 = arith.constant 0xFF800000 : f32
      %54 = vector.broadcast %cst_38 : f32 to vector<32x1xf32>
      %c0_39 = arith.constant 0 : index
      %c0_40 = arith.constant 0 : index
      %55 = vector.load %arg7[%c0_39, %c0_40] : memref<32x1xf32, #tpu.memory_space<vmem>>, vector<32x1xf32>
      tpu.vector_store %arg7[%c0_39, %c0_40], %54 {strides = array<i32>} : memref<32x1xf32, #tpu.memory_space<vmem>>, vector<32x1xf32>,
      %cst_41 = arith.constant 0.000000e+00 : f32
      %56 = vector.broadcast %cst_41 : f32 to vector<32x1xf32>
      %c0_42 = arith.constant 0 : index
      %c0_43 = arith.constant 0 : index
      %57 = vector.load %arg6[%c0_42, %c0_43] : memref<32x1xf32, #tpu.memory_space<vmem>>, vector<32x1xf32>
      tpu.vector_store %arg6[%c0_42, %c0_43], %56 {strides = array<i32>} : memref<32x1xf32, #tpu.memory_space<vmem>>, vector<32x1xf32>,
      %cst_44 = arith.constant 0.000000e+00 : f32
      %58 = vector.broadcast %cst_44 : f32 to vector<32x1xf32>
      %c0_45 = arith.constant 0 : index
      %c0_46 = arith.constant 0 : index
      %59 = vector.load %arg8[%c0_45, %c0_46] : memref<32x1xf32, #tpu.memory_space<vmem>>, vector<32x1xf32>
      tpu.vector_store %arg8[%c0_45, %c0_46], %58 {strides = array<i32>} : memref<32x1xf32, #tpu.memory_space<vmem>>, vector<32x1xf32>,
      %cst_47 = arith.constant 0.000000e+00 : f32
      %60 = vector.broadcast %cst_47 : f32 to vector<32x1xf32>
      %c0_48 = arith.constant 0 : index
      %c0_49 = arith.constant 0 : index
      %61 = vector.load %arg9[%c0_48, %c0_49] : memref<32x1xf32, #tpu.memory_space<vmem>>, vector<32x1xf32>
      tpu.vector_store %arg9[%c0_48, %c0_49], %60 {strides = array<i32>} : memref<32x1xf32, #tpu.memory_space<vmem>>, vector<32x1xf32>,
    } else {
    }
    %c0 = arith.constant 0 : index
    %c0_1 = arith.constant 0 : index
    %3 = vector.load %arg2[%c0, %c0_1] : memref<32x384xf32, #tpu.memory_space<vmem>>, vector<32x384xf32>
    %cst = arith.constant 5.000000e-01 : f32
    %4 = vector.broadcast %cst : f32 to vector<32x384xf32>
    %5 = arith.mulf %3, %4 : vector<32x384xf32>
    %c0_2 = arith.constant 0 : index
    %c0_3 = arith.constant 0 : index
    %6 = vector.load %arg3[%c0_2, %c0_3] : memref<32x384xf32, #tpu.memory_space<vmem>>, vector<32x384xf32>
    %cst_4 = arith.constant 5.000000e-01 : f32
    %7 = vector.broadcast %cst_4 : f32 to vector<32x384xf32>
    %8 = arith.mulf %6, %7 : vector<32x384xf32>
    %c0_5 = arith.constant 0 : index
    %c0_6 = arith.constant 0 : index
    %9 = vector.load %arg5[%c0_5, %c0_6] : memref<32x1xf32, #tpu.memory_space<vmem>>, vector<32x1xf32>
    %cst_7 = arith.constant dense<0xFF800000> : vector<32xf32>
    %10 = vector.multi_reduction <maximumf>, %5, %cst_7 [1] : vector<32x384xf32> to vector<32xf32>
    %11 = vector.shape_cast %10 : vector<32xf32> to vector<32x1xf32>
    %12 = arith.maximumf %9, %11 : vector<32x1xf32>
    %13 = arith.subf %9, %12 : vector<32x1xf32>
    %14 = math.exp %13 : vector<32x1xf32>
    %c0_8 = arith.constant 0 : index
    %c0_9 = arith.constant 0 : index
    %15 = vector.load %arg6[%c0_8, %c0_9] : memref<32x1xf32, #tpu.memory_space<vmem>>, vector<32x1xf32>
    %16 = arith.mulf %14, %15 : vector<32x1xf32>
    %17 = vector.broadcast %12 : vector<32x1xf32> to vector<32x384xf32>
    %18 = arith.subf %5, %17 : vector<32x384xf32>
    %19 = math.exp %18 : vector<32x384xf32>
    %cst_10 = arith.constant 1.000000e+00 : f32
    %20 = vector.broadcast %cst_10 : f32 to vector<384x1xf32>
    %cst_11 = arith.constant dense<0.000000e+00> : vector<32x1xf32>
    %21 = tpu.matmul %19, %20, %cst_11 {dimension_numbers = #tpu.dot_dimension_numbers<[1], [0], [0], [1], [0, 0, 1, 1], [], []>} : vector<32x384xf32>, vector<384x1xf32>, vector<32x1xf32> -> vector<32x1xf32>
    %22 = arith.addf %16, %21 : vector<32x1xf32>
    %c0_12 = arith.constant 0 : index
    %c0_13 = arith.constant 0 : index
    %23 = vector.load %arg6[%c0_12, %c0_13] : memref<32x1xf32, #tpu.memory_space<vmem>>, vector<32x1xf32>
    tpu.vector_store %arg6[%c0_12, %c0_13], %22 {strides = array<i32>} : memref<32x1xf32, #tpu.memory_space<vmem>>, vector<32x1xf32>,
    %c0_14 = arith.constant 0 : index
    %c0_15 = arith.constant 0 : index
    %24 = vector.load %arg5[%c0_14, %c0_15] : memref<32x1xf32, #tpu.memory_space<vmem>>, vector<32x1xf32>
    tpu.vector_store %arg5[%c0_14, %c0_15], %12 {strides = array<i32>} : memref<32x1xf32, #tpu.memory_space<vmem>>, vector<32x1xf32>,
    %c0_16 = arith.constant 0 : index
    %c0_17 = arith.constant 0 : index
    %25 = vector.load %arg7[%c0_16, %c0_17] : memref<32x1xf32, #tpu.memory_space<vmem>>, vector<32x1xf32>
    %cst_18 = arith.constant dense<0xFF800000> : vector<32xf32>
    %26 = vector.multi_reduction <maximumf>, %8, %cst_18 [1] : vector<32x384xf32> to vector<32xf32>
    %27 = vector.shape_cast %26 : vector<32xf32> to vector<32x1xf32>
    %28 = arith.maximumf %25, %27 : vector<32x1xf32>
    %29 = arith.subf %25, %28 : vector<32x1xf32>
    %30 = math.exp %29 : vector<32x1xf32>
    %31 = vector.broadcast %28 : vector<32x1xf32> to vector<32x384xf32>
    %32 = arith.subf %8, %31 : vector<32x384xf32>
    %33 = math.exp %32 : vector<32x384xf32>
    %c0_19 = arith.constant 0 : index
    %c0_20 = arith.constant 0 : index
    %34 = vector.load %arg8[%c0_19, %c0_20] : memref<32x1xf32, #tpu.memory_space<vmem>>, vector<32x1xf32>
    %35 = arith.mulf %30, %34 : vector<32x1xf32>
    %cst_21 = arith.constant 1.000000e+00 : f32
    %36 = vector.broadcast %cst_21 : f32 to vector<384x1xf32>
    %cst_22 = arith.constant dense<0.000000e+00> : vector<32x1xf32>
    %37 = tpu.matmul %33, %36, %cst_22 {dimension_numbers = #tpu.dot_dimension_numbers<[1], [0], [0], [1], [0, 0, 1, 1], [], []>} : vector<32x384xf32>, vector<384x1xf32>, vector<32x1xf32> -> vector<32x1xf32>
    %38 = arith.addf %35, %37 : vector<32x1xf32>
    %c0_23 = arith.constant 0 : index
    %c0_24 = arith.constant 0 : index
    %39 = vector.load %arg8[%c0_23, %c0_24] : memref<32x1xf32, #tpu.memory_space<vmem>>, vector<32x1xf32>
    tpu.vector_store %arg8[%c0_23, %c0_24], %38 {strides = array<i32>} : memref<32x1xf32, #tpu.memory_space<vmem>>, vector<32x1xf32>,
    %c0_25 = arith.constant 0 : index
    %c0_26 = arith.constant 0 : index
    %40 = vector.load %arg9[%c0_25, %c0_26] : memref<32x1xf32, #tpu.memory_space<vmem>>, vector<32x1xf32>
    %41 = arith.mulf %30, %40 : vector<32x1xf32>
    %42 = arith.subf %8, %5 : vector<32x384xf32>
    %43 = arith.mulf %33, %42 : vector<32x384xf32>
    %cst_27 = arith.constant 1.000000e+00 : f32
    %44 = vector.broadcast %cst_27 : f32 to vector<384x1xf32>
    %cst_28 = arith.constant dense<0.000000e+00> : vector<32x1xf32>
    %45 = tpu.matmul %43, %44, %cst_28 {dimension_numbers = #tpu.dot_dimension_numbers<[1], [0], [0], [1], [0, 0, 1, 1], [], []>} : vector<32x384xf32>, vector<384x1xf32>, vector<32x1xf32> -> vector<32x1xf32>
    %46 = arith.addf %41, %45 : vector<32x1xf32>
    %c0_29 = arith.constant 0 : index
    %c0_30 = arith.constant 0 : index
    %47 = vector.load %arg9[%c0_29, %c0_30] : memref<32x1xf32, #tpu.memory_space<vmem>>, vector<32x1xf32>
    tpu.vector_store %arg9[%c0_29, %c0_30], %46 {strides = array<i32>} : memref<32x1xf32, #tpu.memory_space<vmem>>, vector<32x1xf32>,
    %c0_31 = arith.constant 0 : index
    %c0_32 = arith.constant 0 : index
    %48 = vector.load %arg7[%c0_31, %c0_32] : memref<32x1xf32, #tpu.memory_space<vmem>>, vector<32x1xf32>
    tpu.vector_store %arg7[%c0_31, %c0_32], %28 {strides = array<i32>} : memref<32x1xf32, #tpu.memory_space<vmem>>, vector<32x1xf32>,
    %c0_i32_33 = arith.constant 0 : i32
    %49 = arith.cmpi eq, %arg1, %c0_i32_33 : i32
    %50 = arith.extui %49 : i1 to i32
    %c0_i32_34 = arith.constant 0 : i32
    %51 = arith.cmpi ne, %50, %c0_i32_34 : i32
    scf.if %51 {
      %c0_35 = arith.constant 0 : index
      %c0_36 = arith.constant 0 : index
      %52 = vector.load %arg8[%c0_35, %c0_36] : memref<32x1xf32, #tpu.memory_space<vmem>>, vector<32x1xf32>
      %c0_37 = arith.constant 0 : index
      %c0_38 = arith.constant 0 : index
      %53 = vector.load %arg9[%c0_37, %c0_38] : memref<32x1xf32, #tpu.memory_space<vmem>>, vector<32x1xf32>
      %54 = tpu.reciprocal %52 : vector<32x1xf32> -> vector<32x1xf32>
      %55 = arith.mulf %53, %54 : vector<32x1xf32>
      %c0_39 = arith.constant 0 : index
      %c0_40 = arith.constant 0 : index
      %56 = vector.load %arg5[%c0_39, %c0_40] : memref<32x1xf32, #tpu.memory_space<vmem>>, vector<32x1xf32>
      %c0_41 = arith.constant 0 : index
      %c0_42 = arith.constant 0 : index
      %57 = vector.load %arg6[%c0_41, %c0_42] : memref<32x1xf32, #tpu.memory_space<vmem>>, vector<32x1xf32>
      %58 = math.log %57 : vector<32x1xf32>
      %59 = arith.addf %56, %58 : vector<32x1xf32>
      %60 = arith.addf %55, %59 : vector<32x1xf32>
      %c0_43 = arith.constant 0 : index
      %c0_44 = arith.constant 0 : index
      %61 = vector.load %arg7[%c0_43, %c0_44] : memref<32x1xf32, #tpu.memory_space<vmem>>, vector<32x1xf32>
      %62 = math.log %52 : vector<32x1xf32>
      %63 = arith.addf %61, %62 : vector<32x1xf32>
      %64 = arith.subf %60, %63 : vector<32x1xf32>
      %cst_45 = arith.constant dense<0.000000e+00> : vector<1xf32>
      %65 = vector.multi_reduction <add>, %64, %cst_45 [0] : vector<32x1xf32> to vector<1xf32>
      %66 = vector.shape_cast %65 : vector<1xf32> to vector<1x1xf32>
      %67 = tpu.iota {dimensions = array<i32: 0>} : vector<8x128xi32>
      %68 = tpu.iota {dimensions = array<i32: 1>} : vector<8x128xi32>
      %c0_i32_46 = arith.constant 0 : i32
      %69 = vector.broadcast %c0_i32_46 : i32 to vector<8x128xi32>
      %70 = arith.cmpi eq, %67, %69 : vector<8x128xi32>
      %c0_i32_47 = arith.constant 0 : i32
      %71 = vector.broadcast %c0_i32_47 : i32 to vector<8x128xi32>
      %72 = arith.cmpi eq, %68, %71 : vector<8x128xi32>
      %73 = arith.andi %70, %72 : vector<8x128xi1>
      %cst_48 = arith.constant 0.000000e+00 : f32
      %74 = vector.shape_cast %66 : vector<1x1xf32> to vector<1x1xf32>
      %75 = vector.broadcast %74 : vector<1x1xf32> to vector<8x128xf32>
      %76 = vector.broadcast %cst_48 : f32 to vector<8x128xf32>
      %77 = arith.select %73, %75, %76 : vector<8x128xi1>, vector<8x128xf32>
      %c0_49 = arith.constant 0 : index
      %c0_50 = arith.constant 0 : index
      %78 = vector.load %arg4[%c0_49, %c0_50] : memref<8x128xf32, #tpu.memory_space<vmem>>, vector<8x128xf32>
      tpu.vector_store %arg4[%c0_49, %c0_50], %77 {strides = array<i32>} : memref<8x128xf32, #tpu.memory_space<vmem>>, vector<8x128xf32>,
    } else {
    }
    return
  }
  func.func @transform_0(%arg0: i32, %arg1: i32) -> (i32, i32) {
    %c0_i32 = arith.constant 0 : i32
    return %arg0, %arg1 : i32, i32
  }
  func.func @transform_1(%arg0: i32, %arg1: i32) -> (i32, i32) {
    %c0_i32 = arith.constant 0 : i32
    return %arg0, %arg1 : i32, i32
  }
  func.func @transform_2(%arg0: i32, %arg1: i32) -> (i32, i32) {
    %c0_i32 = arith.constant 0 : i32
    %c0_i32_0 = arith.constant 0 : i32
    return %arg0, %c0_i32 : i32, i32
  }
}

</mosaic_0001>

<bundles_post_ra>
// kernel: tpu_custom_call.1
= control target key start
LH: loop header
LB: loop body
LE: loop exit
PB: predicated region body
PF: predicated region fallthrough
CT: control target
= control target key end

     0   :  { %7 = vsyncpa [#allocation8], 0  ;;  %s2015_s0 = inlined_call_operand.hbm [shape: f32[32,384], index: 0, kind: input, shape index: {}]   ;;  %s2016_s1 = inlined_call_operand.hbm [shape: f32[32,384], index: 1, kind: input, shape index: {}]   ;;  %s2017_s2 = inlined_call_operand.hbm [shape: f32[8,128], index: 2, kind: output, shape index: {}]  }
   0x1   :  { %8 = vsyncpa [#allocation11], 0 }
   0x2   :  { %9 = vsyncpa [#allocation9], 0  ;;  %s1465_s9 = smov [#allocation7]  }
   0x3   :  { %s15_s10 = sshll.u32 %s1465_s9, 4  ;;  %s16_s10 = int_to_ptr.vmem [resolvable:$true] %s15_s10 }
   0x4   :  { %s1407_s11 = scalar_lea.vmem %s16_s10, 1536  ;;  %p1412_p1 = scmp.lt.s32.totalorder %s16_s10, %s16_s10 }
   0x5   :  { %p1408_p0 = scmp.ne.s32.totalorder %s16_s10, %s1407_s11  ;;  %p1413_p2 = scmp.lt.s32.totalorder %s1407_s11, %s1407_s11 }
   0x7   :  { %p1414_p3 = por %p1413_p2, %p1412_p1 }
   0x9   :  { %p1415_p4 = pnand %p1414_p3, %p1408_p0 }
   0xb   :  { %1418 = shalt.err (!%p1415_p4)
}
   0xc   :  { %s1466_s12 = smov 384   ;;  %s1467_s13 = smov 24  }
   0xd   :  { %21 = dma.hbm_to_vmem [thread:$0]  %s2015_s0, 1536, %s16_s10, [#allocation8], %s1466_s12, %s1466_s12, %s1467_s13  }
   0xe   :  { %s1468_s16 = smov [#allocation10]  }
   0xf   :  { %s27_s17 = sshll.u32 %s1468_s16, 4  ;;  %s28_s17 = int_to_ptr.vmem [resolvable:$true] %s27_s17 }
  0x10   :  { %s1427_s18 = scalar_lea.vmem %s28_s17, 1536  ;;  %p1432_p6 = scmp.lt.s32.totalorder %s28_s17, %s28_s17 }
  0x11   :  { %p1428_p5 = scmp.ne.s32.totalorder %s28_s17, %s1427_s18  ;;  %p1433_p7 = scmp.lt.s32.totalorder %s1427_s18, %s1427_s18 }
  0x13   :  { %p1434_p8 = por %p1433_p7, %p1432_p6 }
  0x15   :  { %p1435_p9 = pnand %p1434_p8, %p1428_p5 }
  0x17   :  { %1438 = shalt.err (!%p1435_p9)
}
  0x18   :  { %33 = dma.hbm_to_vmem [thread:$0]  %s2016_s1, 1536, %s28_s17, [#allocation11], %s1466_s12, %s1466_s12, %s1467_s13  }
  0x19   :  { %1459 = dma.done.wait [#allocation8], 1536  }
  0x1a   :  { %1460 = vsyncadd [#allocation8], 4294965760 }
  0x1b   :  { %1461 = dma.done.wait [#allocation11], 1536  }
  0x1c   :  { %1462 = vsyncadd [#allocation11], 4294965760  ;;  %vm44_vm0 = vcmask 7168   ;;  %v1469_v0 = vmov -inf   ;;  %v65_v1 = vld [vmem:[#allocation7] sm:$0xff]  ;;  %v66_v2 = vld [vmem:[#allocation7 + $0x8] sm:$0xff] }
  0x1d   :  { %45 = vst.msk [vmem:[#allocation2] sm:$0xff] %vm44_vm0, %v1469_v0  ;;  %46 = vst.msk [vmem:[#allocation2 + $0x8] sm:$0xff] %vm44_vm0, %v1469_v0  ;;  %v67_v3 = vld [vmem:[#allocation7 + $0x10] sm:$0xff]  ;;  %v1503_v4 = vmul.f32 0.5, %v65_v1  ;;  %v1505_v5 = vmul.f32 0.5, %v66_v2  ;;  %v68_v7 = vld [vmem:[#allocation7 + $0x18] sm:$0xff] }
  0x1e   :  { %47 = vst.msk [vmem:[#allocation2 + $0x10] sm:$0xff] %vm44_vm0, %v1469_v0  ;;  %48 = vst.msk [vmem:[#allocation2 + $0x18] sm:$0xff] %vm44_vm0, %v1469_v0  ;;  %v1507_v6 = vmul.f32 0.5, %v67_v3  ;;  %v69_v8 = vld [vmem:[#allocation7 + $0x20] sm:$0xff]  ;;  %v70_v9 = vld [vmem:[#allocation7 + $0x28] sm:$0xff]  ;;  %v1509_v10 = vmul.f32 0.5, %v68_v7 }
  0x1f   :  { %49 = vst.msk [vmem:[#allocation4] sm:$0xff] %vm44_vm0, %v1469_v0  ;;  %50 = vst.msk [vmem:[#allocation4 + $0x8] sm:$0xff] %vm44_vm0, %v1469_v0  ;;  %v1511_v11 = vmul.f32 0.5, %v69_v8  ;;  %v1513_v12 = vmul.f32 0.5, %v70_v9  ;;  %v71_v13 = vld [vmem:[#allocation7 + $0x30] sm:$0xff]  ;;  %v72_v14 = vld [vmem:[#allocation7 + $0x38] sm:$0xff]  ;;  %v117_v16 = vmax.f32 %v1503_v4, %v1505_v5 }
  0x20   :  { %51 = vst.msk [vmem:[#allocation4 + $0x10] sm:$0xff] %vm44_vm0, %v1469_v0  ;;  %52 = vst.msk [vmem:[#allocation4 + $0x18] sm:$0xff] %vm44_vm0, %v1469_v0  ;;  %v73_v15 = vld [vmem:[#allocation7 + $0x40] sm:$0xff]  ;;  %v1517_v17 = vmul.f32 0.5, %v71_v13  ;;  %v1519_v18 = vmul.f32 0.5, %v72_v14  ;;  %v74_v20 = vld [vmem:[#allocation7 + $0x48] sm:$0xff] }
  0x21   :  { %v1521_v19 = vmul.f32 0.5, %v73_v15  ;;  %v75_v21 = vld [vmem:[#allocation7 + $0x50] sm:$0xff]  ;;  %v76_v22 = vld [vmem:[#allocation7 + $0x58] sm:$0xff]  ;;  %v121_v23 = vmax.f32 %v1509_v10, %v1511_v11  ;;  %v1525_v24 = vmul.f32 0.5, %v74_v20  ;;  %v89_v27 = vld [vmem:[#allocation10] sm:$0xff]  ;;  %v118_v30 = vmax.f32 %v117_v16, %v1507_v6  ;;  %s1473_s0 = smov [#allocation12]  }
  0x22   :  { %v1527_v25 = vmul.f32 0.5, %v75_v21  ;;  %v1529_v26 = vmul.f32 0.5, %v76_v22  ;;  %v90_v28 = vld [vmem:[#allocation10 + $0x8] sm:$0xff]  ;;  %v91_v29 = vld [vmem:[#allocation10 + $0x10] sm:$0xff]  ;;  %v125_v31 = vmax.f32 %v1517_v17, %v1519_v18  ;;  %v1534_v32 = vmul.f32 0.5, %v89_v27  ;;  %v92_v34 = vld [vmem:[#allocation10 + $0x18] sm:$0xff] }
  0x23   :  { %v1536_v33 = vmul.f32 0.5, %v90_v28  ;;  %v93_v35 = vld [vmem:[#allocation10 + $0x20] sm:$0xff]  ;;  %v122_v36 = vmax.f32 %v121_v23, %v1513_v12  ;;  %v94_v38 = vld [vmem:[#allocation10 + $0x28] sm:$0xff]  ;;  %v1541_v39 = vmul.f32 0.5, %v92_v34  ;;  %v95_v40 = vld [vmem:[#allocation10 + $0x30] sm:$0xff]  ;;  %119 = vmax.xlane.f32.xlu0 %v118_v30  ;;  %v1544_v43 = vmul.f32 0.5, %v91_v29 }
  0x24   :  { %v129_v37 = vmax.f32 %v1525_v24, %v1527_v25  ;;  %v96_v41 = vld [vmem:[#allocation10 + $0x38] sm:$0xff]  ;;  %v126_v42 = vmax.f32 %v125_v31, %v1521_v19  ;;  %v1548_v45 = vmul.f32 0.5, %v93_v35  ;;  %v98_v46 = vld [vmem:[#allocation10 + $0x48] sm:$0xff]  ;;  %v99_v47 = vld [vmem:[#allocation10 + $0x50] sm:$0xff]  ;;  %v1550_v49 = vmul.f32 0.5, %v95_v40  ;;  %s984_s1 = sshll.u32 %s1473_s0, 4  ;;  %s985_s1 = int_to_ptr.vmem [resolvable:$true] %s984_s1 }
  0x25   :  { %v400_v44 = vmax.f32 %v1534_v32, %v1536_v33  ;;  %v97_v48 = vld [vmem:[#allocation10 + $0x40] sm:$0xff]  ;;  %v1552_v50 = vmul.f32 0.5, %v96_v41  ;;  %v1555_v52 = vmul.f32 0.5, %v94_v38  ;;  %v1559_v54 = vmul.f32 0.5, %v98_v46  ;;  %v100_v55 = vld [vmem:[#allocation10 + $0x58] sm:$0xff]  ;;  %v1655_v9 = vld [vmem:[#allocation2 + $0x10] sm:$0xff]  ;;  %p1444_p11 = scmp.lt.s32.totalorder %s985_s1, %s985_s1 }
  0x26   :  { %127 = vmax.xlane.f32.xlu1 %v126_v42  ;;  %v130_v51 = vmax.f32 %v129_v37, %v1529_v26  ;;  %v404_v53 = vmax.f32 %v1541_v39, %v1548_v45  ;;  %v1561_v56 = vmul.f32 0.5, %v99_v47  ;;  %v1564_v58 = vmul.f32 0.5, %v97_v48  ;;  %v1653_v7 = vld [vmem:[#allocation2] sm:$0xff]  ;;  %v1660_v14 = vld [vmem:[#allocation2 + $0x8] sm:$0xff]  ;;  %v1670_v22 = vld [vmem:[#allocation2 + $0x18] sm:$0xff]  ;;  %s1439_s21 = scalar_lea.vmem %s985_s1, 128 }
  0x27   :  { %123 = vmax.xlane.f32.xlu0 %v122_v36  ;;  %v401_v57 = vmax.f32 %v400_v44, %v1544_v43  ;;  %v408_v59 = vmax.f32 %v1550_v49, %v1552_v50  ;;  %v1569_v61 = vmul.f32 0.5, %v100_v55  ;;  %v1470_v1 = vmov 0   ;;  %v1679_v29 = vld [vmem:[#allocation4] sm:$0xff]  ;;  %v1689_v35 = vld [vmem:[#allocation4 + $0x8] sm:$0xff]  ;;  %v1698_v40 = vld [vmem:[#allocation4 + $0x10] sm:$0xff]  ;;  %p1440_p10 = scmp.ne.s32.totalorder %s985_s1, %s1439_s21  ;;  %p1445_p12 = scmp.lt.s32.totalorder %s1439_s21, %s1439_s21 }
  0x28   :  { %v405_v60 = vmax.f32 %v404_v53, %v1555_v52  ;;  %v412_v62 = vmax.f32 %v1559_v54, %v1561_v56  ;;  %1309 = vset.pattern.permute.xlu0 %v1470_v1  ;;  %1310 = vset.pattern.permute.xlu1 %v1470_v1  ;;  %v1471_v2 = vmov 0.0   ;;  %v1472_v3 = vmov 1.0   ;;  %v1708_v46 = vld [vmem:[#allocation4 + $0x18] sm:$0xff] }
  0x29   :  { %v409_v63 = vmax.f32 %v408_v59, %v1564_v58  ;;  %53 = vst.msk [vmem:[#allocation3] sm:$0xff] %vm44_vm0, %v1471_v2  ;;  %54 = vst.msk [vmem:[#allocation3 + $0x8] sm:$0xff] %vm44_vm0, %v1471_v2  ;;  %994 = vmatprep.subr.mxu0 %v1472_v3  ;;  %1186 = vmatprep.subr.mxu1 %v1472_v3  ;;  %p1446_p13 = por %p1445_p12, %p1444_p11 }
  0x2a   :  { %131 = vmax.xlane.f32.xlu1 %v130_v51  ;;  %v413_v0 = vmax.f32 %v412_v62, %v1569_v61  ;;  %55 = vst.msk [vmem:[#allocation3 + $0x10] sm:$0xff] %vm44_vm0, %v1471_v2  ;;  %56 = vst.msk [vmem:[#allocation3 + $0x18] sm:$0xff] %vm44_vm0, %v1471_v2  ;;  %995 = vmatpush3.msra.mxu0 %v1472_v3 }
  0x2b   :  { %402 = vmax.xlane.f32.xlu0 %v401_v57  ;;  %57 = vst.msk [vmem:[#allocation5] sm:$0xff] %vm44_vm0, %v1471_v2  ;;  %58 = vst.msk [vmem:[#allocation5 + $0x8] sm:$0xff] %vm44_vm0, %v1471_v2  ;;  %1187 = vmatpush3.msra.mxu1 %v1472_v3  ;;  %p1447_p0 = pnand %p1446_p13, %p1440_p10 }
  0x2c   :  { %59 = vst.msk [vmem:[#allocation5 + $0x10] sm:$0xff] %vm44_vm0, %v1471_v2  ;;  %60 = vst.msk [vmem:[#allocation5 + $0x18] sm:$0xff] %vm44_vm0, %v1471_v2  ;;  %996 = vmatprep.subr.mxu0 %v1472_v3  ;;  %1188 = vmatprep.subr.mxu1 %v1472_v3 }
  0x2d   :  { %61 = vst.msk [vmem:[#allocation6] sm:$0xff] %vm44_vm0, %v1471_v2  ;;  %62 = vst.msk [vmem:[#allocation6 + $0x8] sm:$0xff] %vm44_vm0, %v1471_v2  ;;  %997 = vmatpush3.msra.mxu0 %v1472_v3  ;;  %1189 = vmatpush3.msra.mxu1 %v1472_v3 }
  0x2e   :  { %406 = vmax.xlane.f32.xlu1 %v405_v60  ;;  %63 = vst.msk [vmem:[#allocation6 + $0x10] sm:$0xff] %vm44_vm0, %v1471_v2  ;;  %64 = vst.msk [vmem:[#allocation6 + $0x18] sm:$0xff] %vm44_vm0, %v1471_v2  ;;  %998 = vmatprep.subr.mxu0 %v1472_v3 }
  0x2f   :  { %410 = vmax.xlane.f32.xlu0 %v409_v63  ;;  %1190 = vmatprep.subr.mxu1 %v1472_v3 }
  0x30   :  { %999 = vmatpush3.msra.mxu0 %v1472_v3  ;;  %1191 = vmatpush3.msra.mxu1 %v1472_v3 }
  0x31   :  { %1000 = vmatprep.subr.mxu0 %v1472_v3  ;;  %1192 = vmatprep.subr.mxu1 %v1472_v3 }
  0x32   :  { %414 = vmax.xlane.f32.xlu1 %v413_v0  ;;  %1001 = vmatpush3.msra.mxu0 %v1472_v3 }
  0x33   :  { %1193 = vmatpush3.msra.mxu1 %v1472_v3  ;;  %1002 = vmatprep.subr.mxu0 %v1472_v3 }
  0x34   :  { %1194 = vmatprep.subr.mxu1 %v1472_v3  ;;  %1003 = vmatpush3.msra.mxu0 %v1472_v3 }
  0x35   :  { %1195 = vmatpush3.msra.mxu1 %v1472_v3  ;;  %1004 = vmatprep.subr.mxu0 %v1472_v3 }
  0x36   :  { %1196 = vmatprep.subr.mxu1 %v1472_v3  ;;  %1005 = vmatpush3.msra.mxu0 %v1472_v3 }
  0x37   :  { %1197 = vmatpush3.msra.mxu1 %v1472_v3  ;;  %1006 = vmatprep.subr.mxu0 %v1472_v3 }
  0x38   :  { %1198 = vmatprep.subr.mxu1 %v1472_v3  ;;  %1007 = vmatpush3.msra.mxu0 %v1472_v3 }
  0x39   :  { %1199 = vmatpush3.msra.mxu1 %v1472_v3  ;;  %1008 = vmatprep.subr.mxu0 %v1472_v3 }
  0x3a   :  { %1200 = vmatprep.subr.mxu1 %v1472_v3  ;;  %1009 = vmatpush3.msra.mxu0 %v1472_v3 }
  0x3b   :  { %1201 = vmatpush3.msra.mxu1 %v1472_v3  ;;  %1010 = vmatprep.subr.mxu0 %v1472_v3 }
  0x3c   :  { %1202 = vmatprep.subr.mxu1 %v1472_v3  ;;  %1011 = vmatpush3.msra.mxu0 %v1472_v3 }
  0x3d   :  { %1203 = vmatpush3.msra.mxu1 %v1472_v3  ;;  %1012 = vmatprep.subr.mxu0 %v1472_v3 }
  0x3e   :  { %1204 = vmatprep.subr.mxu1 %v1472_v3  ;;  %1013 = vmatpush3.msra.mxu0 %v1472_v3 }
  0x3f   :  { %1205 = vmatpush3.msra.mxu1 %v1472_v3  ;;  %1014 = vmatprep.subr.mxu0 %v1472_v3 }
  0x40   :  { %1206 = vmatprep.subr.mxu1 %v1472_v3  ;;  %1015 = vmatpush3.msra.mxu0 %v1472_v3 }
  0x41   :  { %1207 = vmatpush3.msra.mxu1 %v1472_v3  ;;  %1016 = vmatprep.subr.mxu0 %v1472_v3 }
  0x42   :  { %1208 = vmatprep.subr.mxu1 %v1472_v3  ;;  %1017 = vmatpush3.msra.mxu0 %v1472_v3 }
  0x43   :  { %1209 = vmatpush3.msra.mxu1 %v1472_v3  ;;  %1018 = vmatprep.subr.mxu0 %v1472_v3 }
  0x44   :  { %1210 = vmatprep.subr.mxu1 %v1472_v3  ;;  %1019 = vmatpush3.msra.mxu0 %v1472_v3 }
  0x45   :  { %1211 = vmatpush3.msra.mxu1 %v1472_v3  ;;  %1020 = vmatprep.subr.mxu0 %v1472_v3 }
  0x46   :  { %1212 = vmatprep.subr.mxu1 %v1472_v3  ;;  %1021 = vmatpush3.msra.mxu0 %v1472_v3 }
  0x47   :  { %1213 = vmatpush3.msra.mxu1 %v1472_v3  ;;  %1022 = vmatprep.subr.mxu0 %v1472_v3 }
  0x48   :  { %1214 = vmatprep.subr.mxu1 %v1472_v3  ;;  %1023 = vmatpush3.msra.mxu0 %v1472_v3 }
  0x49   :  { %1215 = vmatpush3.msra.mxu1 %v1472_v3  ;;  %1024 = vmatprep.subr.mxu0 %v1472_v3 }
  0x4a   :  { %1216 = vmatprep.subr.mxu1 %v1472_v3  ;;  %1025 = vmatpush3.msra.mxu0 %v1472_v3 }
  0x4b   :  { %1217 = vmatpush3.msra.mxu1 %v1472_v3  ;;  %1058 = vmatprep.subr.mxu0 %v1472_v3 }
  0x4c   :  { %1224 = vmatprep.subr.mxu1 %v1472_v3 }
  0xac   :  { %v120_v8 = vpop.xlane.xlu0 %119 }
  0xad   :  { %v1658_v13 = vmax.f32 %v1653_v7, %v120_v8 }
  0xaf   :  { %v128_v15 = vpop.xlane.xlu1 %127  ;;  %v137_v16 = vsub.f32 %v1653_v7, %v1658_v13  ;;  %392 = vst.msk [vmem:[#allocation2] sm:$0xff] %vm44_vm0, %v1658_v13  ;;  %159 = vperm.xlu0 %1309, %v1658_v13  }
  0xb0   :  { %v1668_v20 = vmax.f32 %v1655_v9, %v128_v15  ;;  %v124_v21 = vpop.xlane.xlu0 %123 }
  0xb1   :  { %v1673_v23 = vmax.f32 %v1660_v14, %v124_v21 }
  0xb2   :  { %v139_v27 = vsub.f32 %v1655_v9, %v1668_v20  ;;  %394 = vst.msk [vmem:[#allocation2 + $0x10] sm:$0xff] %vm44_vm0, %v1668_v20 }
  0xb3   :  { %v132_v28 = vpop.xlane.xlu1 %131  ;;  %v138_v30 = vsub.f32 %v1660_v14, %v1673_v23  ;;  %393 = vst.msk [vmem:[#allocation2 + $0x8] sm:$0xff] %vm44_vm0, %v1673_v23  ;;  %164 = vperm.xlu1 %1310, %v1673_v23  }
  0xb4   :  { %v1687_v31 = vmax.f32 %v1670_v22, %v132_v28  ;;  %v403_v34 = vpop.xlane.xlu0 %402 }
  0xb5   :  { %v1696_v37 = vmax.f32 %v1679_v29, %v403_v34 }
  0xb6   :  { %v140_v36 = vsub.f32 %v1670_v22, %v1687_v31  ;;  %395 = vst.msk [vmem:[#allocation2 + $0x18] sm:$0xff] %vm44_vm0, %v1687_v31 }
  0xb7   :  { %v407_v38 = vpop.xlane.xlu1 %406  ;;  %169 = vperm.xlu1 %1310, %v1668_v20   ;;  %v420_v41 = vsub.f32 %v1679_v29, %v1696_v37  ;;  %884 = vst.msk [vmem:[#allocation4] sm:$0xff] %vm44_vm0, %v1696_v37 }
  0xb8   :  { %v1706_v42 = vmax.f32 %v1689_v35, %v407_v38  ;;  %v411_v44 = vpop.xlane.xlu0 %410 }
  0xb9   :  { %v1715_v48 = vmax.f32 %v1698_v40, %v411_v44 }
  0xba   :  { %v421_v47 = vsub.f32 %v1689_v35, %v1706_v42  ;;  %885 = vst.msk [vmem:[#allocation4 + $0x8] sm:$0xff] %vm44_vm0, %v1706_v42 }
  0xbb   :  { %v415_v51 = vpop.xlane.xlu1 %414  ;;  %174 = vperm.xlu1 %1310, %v1687_v31   ;;  %886 = vst.msk [vmem:[#allocation4 + $0x10] sm:$0xff] %vm44_vm0, %v1715_v48 }
  0xbc   :  { %v1723_v55 = vmax.f32 %v1708_v46, %v415_v51 }
  0xbe   :  { %887 = vst.msk [vmem:[#allocation4 + $0x18] sm:$0xff] %vm44_vm0, %v1723_v55 }
  0xbf   :  { %434 = vperm.xlu1 %1310, %v1696_v37  }
  0xc3   :  { %439 = vperm.xlu1 %1310, %v1706_v42  }
  0xc7   :  { %444 = vperm.xlu1 %1310, %v1715_v48  }
  0xcb   :  { %449 = vperm.xlu1 %1310, %v1723_v55  }
 0x12a   :  { %v160_v59 = vpop.permute.xlu0 %159 }
 0x12b   :  { %v177_v60 = vsub.f32 %v1503_v4, %v160_v59  ;;  %v178_v62 = vsub.f32 %v1505_v5, %v160_v59  ;;  %v179_v63 = vsub.f32 %v1507_v6, %v160_v59 }
 0x12d   :  { %v189_v0 = vmul.f32 1.442695, %v177_v60  ;;  %v191_v1 = vmul.f32 1.442695, %v178_v62  ;;  %v193_v2 = vmul.f32 1.442695, %v179_v63 }
 0x12e   :  { %v165_v8 = vpop.permute.xlu1 %164 }
 0x12f   :  { %1311 = vpow2.f32 %v189_v0  ;;  %v180_v15 = vsub.f32 %v1509_v10, %v165_v8  ;;  %v181_v21 = vsub.f32 %v1511_v11, %v165_v8  ;;  %v182_v28 = vsub.f32 %v1513_v12, %v165_v8 }
 0x130   :  { %1313 = vpow2.f32 %v191_v1 }
 0x131   :  { %1315 = vpow2.f32 %v193_v2  ;;  %v195_v34 = vmul.f32 1.442695, %v180_v15  ;;  %v197_v38 = vmul.f32 1.442695, %v181_v21  ;;  %v199_v44 = vmul.f32 1.442695, %v182_v28 }
 0x132   :  { %v170_v51 = vpop.permute.xlu1 %169 }
 0x133   :  { %1317 = vpow2.f32 %v195_v34  ;;  %v183_v59 = vsub.f32 %v1517_v17, %v170_v51  ;;  %v184_v60 = vsub.f32 %v1519_v18, %v170_v51  ;;  %v185_v62 = vsub.f32 %v1521_v19, %v170_v51 }
 0x134   :  { %1319 = vpow2.f32 %v197_v38 }
 0x135   :  { %1321 = vpow2.f32 %v199_v44  ;;  %v201_v63 = vmul.f32 1.442695, %v183_v59  ;;  %v203_v0 = vmul.f32 1.442695, %v184_v60  ;;  %v205_v57 = vmul.f32 1.442695, %v185_v62 }
 0x136   :  { %v175_v53 = vpop.permute.xlu1 %174 }
 0x137   :  { %v186_v1 = vsub.f32 %v1525_v24, %v175_v53  ;;  %v187_v2 = vsub.f32 %v1527_v25, %v175_v53  ;;  %v188_v8 = vsub.f32 %v1529_v26, %v175_v53  ;;  %1323 = vpow2.f32 %v203_v0 }
 0x138   :  { %1325 = vpow2.f32 %v201_v63 }
 0x139   :  { %v209_v15 = vmul.f32 1.442695, %v187_v2  ;;  %1327 = vpow2.f32 %v205_v57  ;;  %v211_v21 = vmul.f32 1.442695, %v188_v8  ;;  %v207_v34 = vmul.f32 1.442695, %v186_v1 }
 0x13a   :  { %v1745_v28 = vpop.permute.xlu1 %434 }
 0x13b   :  { %v453_v38 = vsub.f32 %v1536_v33, %v1745_v28  ;;  %v454_v51 = vsub.f32 %v1544_v43, %v1745_v28  ;;  %1329 = vpow2.f32 %v209_v15 }
 0x13c   :  { %v1312_v44 = vpop.eup %1311  ;;  %1331 = vpow2.f32 %v211_v21 }
 0x13d   :  { %v1314_v59 = vpop.eup %1313  ;;  %1333 = vpow2.f32 %v207_v34  ;;  %v466_v53 = vmul.f32 1.442695, %v453_v38  ;;  %v468_v62 = vmul.f32 1.442695, %v454_v51 }
 0x13e   :  { %v1316_v60 = vpop.eup %1315  ;;  %277 = vmatprep.mubr.f32.mxu0 %v1314_v59  ;;  %v440_v15 = vpop.permute.xlu1 %439 }
 0x13f   :  { %1218 = vmatprep.mubr.f32.mxu1 %v1316_v60  ;;  %278 = vmatmul.mubr.f32.vlgmr.msra.gmra.mxu0 %v1312_v44  ;;  %1335 = vpow2.f32 %v466_v53  ;;  %v452_v44 = vsub.f32 %v1534_v32, %v1745_v28  ;;  %v456_v51 = vsub.f32 %v1548_v45, %v440_v15 }
 0x140   :  { %v1318_v57 = vpop.eup %1317  ;;  %1059 = vmatpush3.msra.mxu0 %v1472_v3  ;;  %1337 = vpow2.f32 %v468_v62  ;;  %v455_v62 = vsub.f32 %v1541_v39, %v440_v15 }
 0x141   :  { %v1320_v63 = vpop.eup %1319  ;;  %1060 = vmatprep.subr.mxu0 %v1472_v3  ;;  %v464_v28 = vmul.f32 1.442695, %v452_v44 }
 0x142   :  { %v1322_v0 = vpop.eup %1321  ;;  %1061 = vmatpush3.msra.mxu0 %v1472_v3  ;;  %282 = vmatprep.mubr.f32.mxu0 %v1320_v63  ;;  %v445_v59 = vpop.permute.xlu1 %444  ;;  %v472_v63 = vmul.f32 1.442695, %v456_v51 }
 0x143   :  { %1219 = vmatmul.mubr.f32.vlgmr.msra.gmra.mxu1 %v1322_v0  ;;  %1062 = vmatprep.subr.mxu0 %v1472_v3  ;;  %v460_v0 = vsub.f32 %v1564_v58, %v445_v59  ;;  %1339 = vpow2.f32 %v464_v28 }
 0x144   :  { %1225 = vmatpush3.msra.mxu1 %v1472_v3  ;;  %283 = vmatmul.mubr.f32.gmra.mxu0 %v1318_v57  ;;  %v1324_v1 = vpop.eup %1323  ;;  %v457_v57 = vsub.f32 %v1555_v52, %v440_v15  ;;  %v470_v15 = vmul.f32 1.442695, %v455_v62  ;;  %1341 = vpow2.f32 %v472_v63 }
 0x145   :  { %1063 = vmatpush3.msra.mxu0 %v1472_v3  ;;  %1226 = vmatprep.subr.mxu1 %v1472_v3  ;;  %v1326_v2 = vpop.eup %1325 }
 0x146   :  { %1064 = vmatprep.subr.mxu0 %v1472_v3  ;;  %1227 = vmatpush3.msra.mxu1 %v1472_v3  ;;  %v1328_v8 = vpop.eup %1327 }
 0x147   :  { %1065 = vmatpush3.msra.mxu0 %v1472_v3  ;;  %1228 = vmatprep.subr.mxu1 %v1472_v3 }
 0x148   :  { %287 = vmatprep.mubr.f32.mxu0 %v1324_v1  ;;  %1066 = vmatprep.subr.mxu0 %v1472_v3  ;;  %v1330_v21 = vpop.eup %1329  ;;  %v459_v1 = vsub.f32 %v1552_v50, %v445_v59 }
 0x149   :  { %1229 = vmatpush3.msra.mxu1 %v1472_v3  ;;  %288 = vmatmul.mubr.f32.gmra.mxu0 %v1326_v2  ;;  %v1332_v34 = vpop.eup %1331  ;;  %v450_v2 = vpop.permute.xlu1 %449 }
 0x14a   :  { %1221 = vmatprep.mubr.f32.mxu1 %v1328_v8  ;;  %1067 = vmatpush3.msra.mxu0 %v1472_v3  ;;  %v1334_v38 = vpop.eup %1333  ;;  %v474_v8 = vmul.f32 1.442695, %v457_v57  ;;  %v478_v44 = vmul.f32 1.442695, %v459_v1  ;;  %v462_v51 = vsub.f32 %v1561_v56, %v450_v2  ;;  %v461_v57 = vsub.f32 %v1559_v54, %v450_v2 }
 0x14b   :  { %1230 = vmatprep.subr.mxu1 %v1472_v3  ;;  %1068 = vmatprep.subr.mxu0 %v1472_v3 }
 0x14c   :  { %1231 = vmatpush3.msra.mxu1 %v1472_v3  ;;  %1069 = vmatpush3.msra.mxu0 %v1472_v3  ;;  %v1775_v60 = vpop.eup %1335  ;;  %1343 = vpow2.f32 %v474_v8  ;;  %v484_v62 = vmul.f32 1.442695, %v462_v51  ;;  %v683_v51 = vsub.f32 %v1536_v33, %v1505_v5  ;;  %v682_v33 = vsub.f32 %v1534_v32, %v1503_v4 }
 0x14d   :  { %1232 = vmatprep.subr.mxu1 %v1472_v3  ;;  %292 = vmatprep.mubr.f32.mxu0 %v1330_v21  ;;  %v1779_v53 = vpop.eup %1337  ;;  %v480_v21 = vmul.f32 1.442695, %v460_v0  ;;  %1345 = vpow2.f32 %v470_v15  ;;  %v482_v0 = vmul.f32 1.442695, %v461_v57  ;;  %v690_v32 = vsub.f32 %v1564_v58, %v1521_v19 }
 0x14e   :  { %1222 = vmatmul.mubr.f32.gmra.mxu1 %v1332_v34  ;;  %1070 = vmatprep.subr.mxu0 %v1472_v3  ;;  %v463_v34 = vsub.f32 %v1569_v61, %v450_v2  ;;  %v695_v5 = vmul.f32 %v1775_v60, %v683_v51  ;;  %v693_v19 = vsub.f32 %v1569_v61, %v1529_v26 }
 0x14f   :  { %1233 = vmatpush3.msra.mxu1 %v1472_v3  ;;  %293 = vmatmul.mubr.f32.gmra.mxu0 %v1334_v38  ;;  %v458_v38 = vsub.f32 %v1550_v49, %v445_v59  ;;  %1347 = vpow2.f32 %v480_v21  ;;  %v692_v58 = vsub.f32 %v1561_v56, %v1527_v25  ;;  %v141_v25 = vmul.f32 1.442695, %v137_v16  ;;  %v149_v16 = vld [vmem:[#allocation3] sm:$0xff] }
 0x150   :  { %1071 = vmatpush3.msra.mxu0 %v1472_v3  ;;  %1234 = vmatprep.subr.mxu1 %v1472_v3  ;;  %v486_v28 = vmul.f32 1.442695, %v463_v34  ;;  %1349 = vpow2.f32 %v478_v44  ;;  %v1825_v63 = vpop.eup %1339  ;;  %v684_v34 = vsub.f32 %v1544_v43, %v1507_v6  ;;  %v147_v56 = vmul.f32 1.442695, %v140_v36 }
 0x151   :  { %1072 = vmatprep.subr.mxu0 %v1472_v3  ;;  %1235 = vmatpush3.msra.mxu1 %v1472_v3  ;;  %v476_v59 = vmul.f32 1.442695, %v458_v38  ;;  %v1829_v1 = vpop.eup %1341  ;;  %v694_v4 = vmul.f32 %v1825_v63, %v682_v33 }
 0x152   :  { %1073 = vmatpush3.msra.mxu0 %v1472_v3  ;;  %1236 = vmatprep.subr.mxu1 %v1472_v3  ;;  %1351 = vpow2.f32 %v486_v28  ;;  %v696_v6 = vmul.f32 %v1779_v53, %v684_v34  ;;  %v687_v28 = vsub.f32 %v1555_v52, %v1513_v12 }
 0x153   :  { %1074 = vmatprep.subr.mxu0 %v1472_v3  ;;  %560 = vmatprep.mubr.f32.mxu0 %v1775_v60  ;;  %1353 = vpow2.f32 %v476_v59  ;;  %v686_v60 = vsub.f32 %v1548_v45, %v1511_v11  ;;  %v685_v11 = vsub.f32 %v1541_v39, %v1509_v10  ;;  %v689_v45 = vsub.f32 %v1552_v50, %v1519_v18 }
 0x154   :  { %1237 = vmatpush3.msra.mxu1 %v1472_v3  ;;  %1256 = vmatprep.mubr.f32.mxu1 %v1779_v53  ;;  %1355 = vpow2.f32 %v484_v62  ;;  %v688_v18 = vsub.f32 %v1550_v49, %v1517_v17  ;;  %v143_v49 = vmul.f32 1.442695, %v138_v30 }
 0x155   :  { %1075 = vmatpush3.msra.mxu0 %v1472_v3  ;;  %1238 = vmatprep.subr.mxu1 %v1472_v3  ;;  %1357 = vpow2.f32 %v482_v0  ;;  %v698_v12 = vmul.f32 %v1829_v1, %v686_v60 }
 0x156   :  { %1076 = vmatprep.subr.mxu0 %v1472_v3  ;;  %1239 = vmatpush3.msra.mxu1 %v1472_v3  ;;  %1359 = vpow2.f32 %v141_v25 }
 0x157   :  { %1077 = vmatpush3.msra.mxu0 %v1472_v3  ;;  %1240 = vmatprep.subr.mxu1 %v1472_v3  ;;  %1361 = vpow2.f32 %v143_v49 }
 0x158   :  { %1078 = vmatprep.subr.mxu0 %v1472_v3  ;;  %1241 = vmatpush3.msra.mxu1 %v1472_v3 }
 0x159   :  { %1079 = vmatpush3.msra.mxu0 %v1472_v3  ;;  %1242 = vmatprep.subr.mxu1 %v1472_v3  ;;  %v1837_v2 = vpop.eup %1343 }
 0x15a   :  { %1080 = vmatprep.subr.mxu0 %v1472_v3  ;;  %1243 = vmatpush3.msra.mxu1 %v1472_v3  ;;  %v1841_v8 = vpop.eup %1345  ;;  %v699_v10 = vmul.f32 %v1837_v2, %v687_v28 }
 0x15b   :  { %1081 = vmatpush3.msra.mxu0 %v1472_v3  ;;  %1244 = vmatprep.subr.mxu1 %v1472_v3  ;;  %v697_v39 = vmul.f32 %v1841_v8, %v685_v11 }
 0x15c   :  { %1082 = vmatprep.subr.mxu0 %v1472_v3  ;;  %1245 = vmatpush3.msra.mxu1 %v1472_v3  ;;  %v1845_v15 = vpop.eup %1347 }
 0x15d   :  { %1083 = vmatpush3.msra.mxu0 %v1472_v3  ;;  %1246 = vmatprep.subr.mxu1 %v1472_v3  ;;  %v1849_v21 = vpop.eup %1349  ;;  %v702_v52 = vmul.f32 %v1845_v15, %v690_v32 }
 0x15e   :  { %1084 = vmatprep.subr.mxu0 %v1472_v3  ;;  %1247 = vmatpush3.msra.mxu1 %v1472_v3  ;;  %v701_v50 = vmul.f32 %v1849_v21, %v689_v45  ;;  %v426_v45 = vmul.f32 1.442695, %v421_v47 }
 0x15f   :  { %1085 = vmatpush3.msra.mxu0 %v1472_v3  ;;  %1248 = vmatprep.subr.mxu1 %v1472_v3  ;;  %v1859_v38 = vpop.eup %1351 }
 0x160   :  { %1086 = vmatprep.subr.mxu0 %v1472_v3  ;;  %1249 = vmatpush3.msra.mxu1 %v1472_v3  ;;  %v1863_v44 = vpop.eup %1353  ;;  %v705_v26 = vmul.f32 %v1859_v38, %v693_v19 }
 0x161   :  { %1087 = vmatpush3.msra.mxu0 %v1472_v3  ;;  %1250 = vmatprep.subr.mxu1 %v1472_v3  ;;  %v1870_v43 = vpop.eup %1355  ;;  %v700_v61 = vmul.f32 %v1863_v44, %v688_v18 }
 0x162   :  { %1088 = vmatprep.subr.mxu0 %v1472_v3  ;;  %1251 = vmatpush3.msra.mxu1 %v1472_v3  ;;  %v1881_v53 = vpop.eup %1357  ;;  %v704_v59 = vmul.f32 %v1870_v43, %v692_v58  ;;  %v488_v58 = vld [vmem:[#allocation5] sm:$0xff] }
 0x163   :  { %1089 = vmatpush3.msra.mxu0 %v1472_v3  ;;  %1252 = vmatprep.subr.mxu1 %v1472_v3  ;;  %v1360_v7 = vpop.eup %1359 }
 0x164   :  { %561 = vmatmul.mubr.f32.vlgmr.msra.gmra.mxu0 %v1825_v63  ;;  %1253 = vmatpush3.msra.mxu1 %v1472_v3  ;;  %v1362_v30 = vpop.eup %1361  ;;  %v153_v63 = vmul.f32 %v1360_v7, %v149_v16 }
 0x165   :  { %1122 = vmatprep.subr.mxu0 %v1472_v3  ;;  %565 = vmatprep.mubr.f32.mxu0 %v1829_v1  ;;  %v150_v1 = vld [vmem:[#allocation3 + $0x8] sm:$0xff] }
 0x166   :  { %1254 = vmatprep.subr.mxu1 %v1472_v3  ;;  %1123 = vmatpush3.msra.mxu0 %v1472_v3 }
 0x167   :  { %1255 = vmatpush3.msra.mxu1 %v1472_v3  ;;  %1124 = vmatprep.subr.mxu0 %v1472_v3 }
 0x168   :  { %1257 = vmatmul.mubr.f32.vlgmr.msra.gmra.mxu1 %v1837_v2  ;;  %1125 = vmatpush3.msra.mxu0 %v1472_v3  ;;  %v154_v2 = vmul.f32 %v1362_v30, %v150_v1  ;;  %v491_v30 = vld [vmem:[#allocation5 + $0x18] sm:$0xff] }
 0x169   :  { %1262 = vmatprep.subr.mxu1 %v1472_v3  ;;  %566 = vmatmul.mubr.f32.gmra.mxu0 %v1841_v8 }
 0x16a   :  { %1259 = vmatprep.mubr.f32.mxu1 %v1845_v15  ;;  %1126 = vmatprep.subr.mxu0 %v1472_v3 }
 0x16b   :  { %1263 = vmatpush3.msra.mxu1 %v1472_v3  ;;  %570 = vmatprep.mubr.f32.mxu0 %v1849_v21 }
 0x16c   :  { %1127 = vmatpush3.msra.mxu0 %v1472_v3  ;;  %1264 = vmatprep.subr.mxu1 %v1472_v3 }
 0x16d   :  { %1128 = vmatprep.subr.mxu0 %v1472_v3  ;;  %1265 = vmatpush3.msra.mxu1 %v1472_v3 }
 0x16e   :  { %1260 = vmatmul.mubr.f32.gmra.mxu1 %v1859_v38  ;;  %1129 = vmatpush3.msra.mxu0 %v1472_v3  ;;  %v151_v38 = vld [vmem:[#allocation3 + $0x10] sm:$0xff] }
 0x16f   :  { %1266 = vmatprep.subr.mxu1 %v1472_v3  ;;  %571 = vmatmul.mubr.f32.gmra.mxu0 %v1863_v44 }
 0x170   :  { %1130 = vmatprep.subr.mxu0 %v1472_v3  ;;  %1267 = vmatpush3.msra.mxu1 %v1472_v3 }
 0x171   :  { %1294 = vmatprep.mubr.f32.mxu1 %v696_v6  ;;  %575 = vmatprep.mubr.f32.mxu0 %v1870_v43 }
 0x172   :  { %1131 = vmatpush3.msra.mxu0 %v1472_v3  ;;  %1268 = vmatprep.subr.mxu1 %v1472_v3 }
 0x173   :  { %1132 = vmatprep.subr.mxu0 %v1472_v3  ;;  %1269 = vmatpush3.msra.mxu1 %v1472_v3 }
 0x174   :  { %1133 = vmatpush3.msra.mxu0 %v1472_v3  ;;  %1270 = vmatprep.subr.mxu1 %v1472_v3 }
 0x175   :  { %576 = vmatmul.mubr.f32.gmra.mxu0 %v1881_v53  ;;  %1134 = vmatprep.subr.mxu0 %v1472_v3 }
 0x176   :  { %1271 = vmatpush3.msra.mxu1 %v1472_v3  ;;  %1135 = vmatpush3.msra.mxu0 %v1472_v3 }
 0x177   :  { %770 = vmatprep.mubr.f32.mxu0 %v695_v5  ;;  %1272 = vmatprep.subr.mxu1 %v1472_v3  ;;  %v152_v5 = vld [vmem:[#allocation3 + $0x18] sm:$0xff] }
 0x178   :  { %1136 = vmatprep.subr.mxu0 %v1472_v3  ;;  %1273 = vmatpush3.msra.mxu1 %v1472_v3 }
 0x179   :  { %1137 = vmatpush3.msra.mxu0 %v1472_v3  ;;  %1274 = vmatprep.subr.mxu1 %v1472_v3 }
 0x17a   :  { %1138 = vmatprep.subr.mxu0 %v1472_v3  ;;  %1275 = vmatpush3.msra.mxu1 %v1472_v3 }
 0x17b   :  { %1139 = vmatpush3.msra.mxu0 %v1472_v3  ;;  %1276 = vmatprep.subr.mxu1 %v1472_v3 }
 0x17c   :  { %1140 = vmatprep.subr.mxu0 %v1472_v3  ;;  %1277 = vmatpush3.msra.mxu1 %v1472_v3 }
 0x17d   :  { %1141 = vmatpush3.msra.mxu0 %v1472_v3  ;;  %1278 = vmatprep.subr.mxu1 %v1472_v3 }
 0x17e   :  { %1142 = vmatprep.subr.mxu0 %v1472_v3  ;;  %1279 = vmatpush3.msra.mxu1 %v1472_v3 }
 0x17f   :  { %1143 = vmatpush3.msra.mxu0 %v1472_v3  ;;  %1280 = vmatprep.subr.mxu1 %v1472_v3 }
 0x180   :  { %1144 = vmatprep.subr.mxu0 %v1472_v3  ;;  %1281 = vmatpush3.msra.mxu1 %v1472_v3 }
 0x181   :  { %1145 = vmatpush3.msra.mxu0 %v1472_v3  ;;  %1282 = vmatprep.subr.mxu1 %v1472_v3 }
 0x182   :  { %1146 = vmatprep.subr.mxu0 %v1472_v3  ;;  %1283 = vmatpush3.msra.mxu1 %v1472_v3 }
 0x183   :  { %1147 = vmatpush3.msra.mxu0 %v1472_v3  ;;  %1284 = vmatprep.subr.mxu1 %v1472_v3 }
 0x184   :  { %1148 = vmatprep.subr.mxu0 %v1472_v3  ;;  %1285 = vmatpush3.msra.mxu1 %v1472_v3 }
 0x185   :  { %1149 = vmatpush3.msra.mxu0 %v1472_v3  ;;  %1286 = vmatprep.subr.mxu1 %v1472_v3 }
 0x186   :  { %1150 = vmatprep.subr.mxu0 %v1472_v3  ;;  %1287 = vmatpush3.msra.mxu1 %v1472_v3 }
 0x187   :  { %1151 = vmatpush3.msra.mxu0 %v1472_v3  ;;  %1288 = vmatprep.subr.mxu1 %v1472_v3 }
 0x188   :  { %1152 = vmatprep.subr.mxu0 %v1472_v3  ;;  %1289 = vmatpush3.msra.mxu1 %v1472_v3 }
 0x189   :  { %1153 = vmatpush3.msra.mxu0 %v1472_v3  ;;  %1290 = vmatprep.subr.mxu1 %v1472_v3 }
 0x18a   :  { %771 = vmatmul.mubr.f32.vlgmr.msra.gmra.mxu0 %v694_v4  ;;  %1291 = vmatpush3.msra.mxu1 %v1472_v3 }
 0x18b   :  { %775 = vmatprep.mubr.f32.mxu0 %v698_v12  ;;  %1292 = vmatprep.subr.mxu1 %v1472_v3  ;;  %v424_v12 = vmul.f32 1.442695, %v420_v41 }
 0x18c   :  { %1293 = vmatpush3.msra.mxu1 %v1472_v3  ;;  %v691_v3 = vsub.f32 %v1559_v54, %v1525_v24  ;;  %v145_v24 = vmul.f32 1.442695, %v139_v27 }
 0x18d   :  { %1295 = vmatmul.mubr.f32.vlgmr.msra.gmra.mxu1 %v699_v10  ;;  %v2018_v10 = vsub.f32 %v1698_v40, %v1715_v48  ;;  %v489_v40 = vld [vmem:[#allocation5 + $0x8] sm:$0xff] }
 0x18e   :  { %776 = vmatmul.mubr.f32.gmra.mxu0 %v697_v39  ;;  %1297 = vmatprep.mubr.f32.mxu1 %v702_v52  ;;  %v703_v17 = vmul.f32 %v1881_v53, %v691_v3  ;;  %1363 = vpow2.f32 %v145_v24  ;;  %v2019_v52 = vsub.f32 %v1708_v46, %v1723_v55 }
 0x18f   :  { %780 = vmatprep.mubr.f32.mxu0 %v701_v50  ;;  %1365 = vpow2.f32 %v147_v56  ;;  %v428_v19 = vmul.f32 1.442695, %v2018_v10 }
 0x190   :  { %1367 = vpow2.f32 %v424_v12  ;;  %v430_v18 = vmul.f32 1.442695, %v2019_v52 }
 0x191   :  { %1298 = vmatmul.mubr.f32.gmra.mxu1 %v705_v26  ;;  %1369 = vpow2.f32 %v426_v45 }
 0x192   :  { %781 = vmatmul.mubr.f32.gmra.mxu0 %v700_v61  ;;  %1371 = vpow2.f32 %v428_v19  ;;  %v676_v19 = vld [vmem:[#allocation6 + $0x10] sm:$0xff] }
 0x193   :  { %785 = vmatprep.mubr.f32.mxu0 %v704_v59  ;;  %1373 = vpow2.f32 %v430_v18 }
 0x196   :  { %786 = vmatmul.mubr.f32.gmra.mxu0 %v703_v17 }
 0x19b   :  { %v1364_v21 = vpop.eup %1363 }
 0x19c   :  { %v1366_v43 = vpop.eup %1365  ;;  %v155_v51 = vmul.f32 %v1364_v21, %v151_v38  ;;  %v674_v38 = vld [vmem:[#allocation6] sm:$0xff] }
 0x19d   :  { %v156_v4 = vmul.f32 %v1366_v43, %v152_v5  ;;  %v1368_v41 = vpop.eup %1367  ;;  %v675_v5 = vld [vmem:[#allocation6 + $0x8] sm:$0xff] }
 0x19e   :  { %v1988_v42 = vpop.eup %1369  ;;  %v492_v47 = vmul.f32 %v1368_v41, %v488_v58 }
 0x19f   :  { %v493_v17 = vmul.f32 %v1988_v42, %v489_v40  ;;  %v1992_v24 = vpop.eup %1371  ;;  %v679_v45 = vmul.f32 %v1988_v42, %v675_v5 }
 0x1ff   :  { %v1026_v54 = vpop.f32.mrf.mxu0 }
 0x201   :  { %v1027_v57 = vpop.f32.mrf.mxu0 }
 0x202   :  { %v1028_v62 = vadd.f32 %v1027_v57, %v1026_v54  ;;  %v490_v54 = vld [vmem:[#allocation5 + $0x10] sm:$0xff] }
 0x203   :  { %v1220_v13 = vpop.f32.mrf.mxu1  ;;  %v494_v7 = vmul.f32 %v1992_v24, %v490_v54 }
 0x204   :  { %v1029_v14 = vpop.f32.mrf.mxu0 }
 0x205   :  { %v364_v23 = vpop.f32.mrf.mxu1 }
 0x206   :  { %v365_v0 = vadd.f32 %v1028_v62, %v364_v23  ;;  %v1030_v9 = vpop.f32.mrf.mxu0  ;;  %v1996_v23 = vpop.eup %1373 }
 0x207   :  { %v1031_v20 = vadd.f32 %v1030_v9, %v1029_v14  ;;  %v495_v1 = vmul.f32 %v1996_v23, %v491_v30 }
 0x208   :  { %v383_v27 = vadd.f32 %v365_v0, %v153_v63 }
 0x209   :  { %v370_v8 = vadd.f32 %v1220_v13, %v1031_v20  ;;  %v1032_v22 = vpop.f32.mrf.mxu0 }
 0x20a   :  { %388 = vst.msk [vmem:[#allocation3] sm:$0xff] %vm44_vm0, %v383_v27 }
 0x20b   :  { %v384_v31 = vadd.f32 %v370_v8, %v154_v2  ;;  %v1033_v36 = vpop.f32.mrf.mxu0 }
 0x20c   :  { %v1034_v15 = vadd.f32 %v1033_v36, %v1032_v22 }
 0x20d   :  { %389 = vst.msk [vmem:[#allocation3 + $0x8] sm:$0xff] %vm44_vm0, %v384_v31 }
 0x20e   :  { %v1223_v34 = vpop.f32.mrf.mxu1 }
 0x20f   :  { %v1035_v44 = vpop.f32.mrf.mxu0 }
 0x210   :  { %v374_v6 = vpop.f32.mrf.mxu1 }
 0x211   :  { %v375_v53 = vadd.f32 %v1034_v15, %v374_v6  ;;  %v1036_v33 = vpop.f32.mrf.mxu0  ;;  %v911_v27 = vld [vmem:[#allocation3] sm:$0xff] }
 0x212   :  { %v1037_v60 = vadd.f32 %v1036_v33, %v1035_v44  ;;  %1375 = vlog2.f32 %v911_v27  ;;  %v909_v27 = vld [vmem:[#allocation2 + $0x10] sm:$0xff] }
 0x213   :  { %v385_v28 = vadd.f32 %v375_v53, %v155_v51  ;;  %v678_v51 = vmul.f32 %v1368_v41, %v674_v38 }
 0x214   :  { %v380_v11 = vadd.f32 %v1223_v34, %v1037_v60  ;;  %v912_v2 = vld [vmem:[#allocation3 + $0x8] sm:$0xff] }
 0x215   :  { %390 = vst.msk [vmem:[#allocation3 + $0x10] sm:$0xff] %vm44_vm0, %v385_v28  ;;  %1377 = vlog2.f32 %v912_v2 }
 0x216   :  { %v386_v32 = vadd.f32 %v380_v11, %v156_v4 }
 0x218   :  { %391 = vst.msk [vmem:[#allocation3 + $0x18] sm:$0xff] %vm44_vm0, %v386_v32 }
 0x21c   :  { %v913_v8 = vld [vmem:[#allocation3 + $0x10] sm:$0xff] }
 0x21d   :  { %1379 = vlog2.f32 %v913_v8 }
 0x21f   :  { %v914_v60 = vld [vmem:[#allocation3 + $0x18] sm:$0xff]  ;;  %v1376_v41 = vpop.eup %1375 }
 0x224   :  { %v1090_v39 = vpop.f32.mrf.mxu0 }
 0x226   :  { %v1091_v29 = vpop.f32.mrf.mxu0 }
 0x227   :  { %v1092_v37 = vadd.f32 %v1091_v29, %v1090_v39 }
 0x228   :  { %v1258_v50 = vpop.f32.mrf.mxu1 }
 0x229   :  { %v1093_v26 = vpop.f32.mrf.mxu0 }
 0x22a   :  { %v647_v35 = vpop.f32.mrf.mxu1 }
 0x22b   :  { %v648_v61 = vadd.f32 %v1092_v37, %v647_v35  ;;  %v1094_v48 = vpop.f32.mrf.mxu0  ;;  %v677_v35 = vld [vmem:[#allocation6 + $0x18] sm:$0xff] }
 0x22c   :  { %v1095_v3 = vadd.f32 %v1094_v48, %v1093_v26  ;;  %v1378_v26 = vpop.eup %1377 }
 0x22d   :  { %v666_v59 = vadd.f32 %v648_v61, %v492_v47  ;;  %v1380_v47 = vpop.eup %1379 }
 0x22e   :  { %v653_v46 = vadd.f32 %v1258_v50, %v1095_v3  ;;  %v1261_v55 = vpop.f32.mrf.mxu1  ;;  %v680_v50 = vmul.f32 %v1992_v24, %v676_v19  ;;  %v934_v19 = vld [vmem:[#allocation4 + $0x18] sm:$0xff] }
 0x22f   :  { %670 = vst.msk [vmem:[#allocation5] sm:$0xff] %vm44_vm0, %v666_v59  ;;  %v1096_v25 = vpop.f32.mrf.mxu0  ;;  %v681_v59 = vmul.f32 %v1996_v23, %v677_v35 }
 0x230   :  { %v667_v49 = vadd.f32 %v653_v46, %v493_v17  ;;  %v657_v62 = vpop.f32.mrf.mxu1 }
 0x231   :  { %v1097_v56 = vpop.f32.mrf.mxu0 }
 0x232   :  { %671 = vst.msk [vmem:[#allocation5 + $0x8] sm:$0xff] %vm44_vm0, %v667_v49  ;;  %v1098_v57 = vadd.f32 %v1097_v56, %v1096_v25  ;;  %v918_v25 = vmul.f32 0.6931472, %v1378_v26 }
 0x234   :  { %v658_v13 = vadd.f32 %v1098_v57, %v657_v62 }
 0x235   :  { %v1099_v16 = vpop.f32.mrf.mxu0 }
 0x236   :  { %v668_v14 = vadd.f32 %v658_v13, %v494_v7  ;;  %v891_v36 = vld [vmem:[#allocation5] sm:$0xff] }
 0x237   :  { %v1100_v63 = vpop.f32.mrf.mxu0  ;;  %v907_v13 = vld [vmem:[#allocation2] sm:$0xff] }
 0x238   :  { %672 = vst.msk [vmem:[#allocation5 + $0x10] sm:$0xff] %vm44_vm0, %v668_v14  ;;  %v1101_v0 = vadd.f32 %v1100_v63, %v1099_v16  ;;  %v908_v16 = vld [vmem:[#allocation2 + $0x8] sm:$0xff]  ;;  %v920_v14 = vmul.f32 0.6931472, %v1380_v47 }
 0x239   :  { %v892_v31 = vld [vmem:[#allocation5 + $0x8] sm:$0xff] }
 0x23a   :  { %v663_v9 = vadd.f32 %v1261_v55, %v1101_v0  ;;  %1381 = vlog2.f32 %v892_v31  ;;  %v916_v55 = vmul.f32 0.6931472, %v1376_v41  ;;  %v924_v0 = vadd.f32 %v918_v25, %v908_v16 }
 0x23b   :  { %1383 = vrcp.f32 %v891_v36 }
 0x23c   :  { %v669_v20 = vadd.f32 %v663_v9, %v495_v1  ;;  %1385 = vlog2.f32 %v891_v36  ;;  %v923_v63 = vadd.f32 %v916_v55, %v907_v13  ;;  %v932_v9 = vld [vmem:[#allocation4 + $0x8] sm:$0xff] }
 0x23d   :  { %1387 = vrcp.f32 %v892_v31 }
 0x23e   :  { %673 = vst.msk [vmem:[#allocation5 + $0x18] sm:$0xff] %vm44_vm0, %v669_v20 }
 0x23f   :  { %v893_v6 = vld [vmem:[#allocation5 + $0x10] sm:$0xff] }
 0x240   :  { %1389 = vlog2.f32 %v893_v6 }
 0x241   :  { %1391 = vlog2.f32 %v914_v60 }
 0x242   :  { %1393 = vrcp.f32 %v893_v6 }
 0x245   :  { %v894_v12 = vld [vmem:[#allocation5 + $0x18] sm:$0xff] }
 0x246   :  { %1395 = vlog2.f32 %v894_v12 }
 0x247   :  { %1397 = vrcp.f32 %v894_v12  ;;  %v1382_v48 = vpop.eup %1381 }
 0x248   :  { %v1384_v3 = vpop.eup %1383  ;;  %v938_v57 = vmul.f32 0.6931472, %v1382_v48 }
 0x249   :  { %v1386_v49 = vpop.eup %1385 }
 0x24a   :  { %v1154_v22 = vpop.f32.mrf.mxu0  ;;  %v1388_v24 = vpop.eup %1387  ;;  %v936_v23 = vmul.f32 0.6931472, %v1386_v49  ;;  %v944_v31 = vadd.f32 %v938_v57, %v932_v9 }
 0x24c   :  { %v1155_v15 = vpop.f32.mrf.mxu0 }
 0x24d   :  { %v1156_v21 = vadd.f32 %v1155_v15, %v1154_v22  ;;  %v1296_v34 = vpop.f32.mrf.mxu1  ;;  %v1390_v62 = vpop.eup %1389 }
 0x24e   :  { %v1157_v44 = vpop.f32.mrf.mxu0  ;;  %v1392_v1 = vpop.eup %1391  ;;  %v940_v22 = vmul.f32 0.6931472, %v1390_v62 }
 0x24f   :  { %v857_v43 = vpop.f32.mrf.mxu1  ;;  %v1394_v20 = vpop.eup %1393 }
 0x250   :  { %v858_v53 = vadd.f32 %v1156_v21, %v857_v43  ;;  %v1158_v33 = vpop.f32.mrf.mxu0  ;;  %v925_v21 = vadd.f32 %v920_v14, %v909_v27 }
 0x251   :  { %v1159_v28 = vadd.f32 %v1158_v33, %v1157_v44  ;;  %v1299_v11 = vpop.f32.mrf.mxu1  ;;  %v922_v44 = vmul.f32 0.6931472, %v1392_v1 }
 0x252   :  { %v876_v4 = vadd.f32 %v858_v53, %v678_v51  ;;  %v1160_v32 = vpop.f32.mrf.mxu0  ;;  %v933_v51 = vld [vmem:[#allocation4 + $0x10] sm:$0xff] }
 0x253   :  { %v863_v10 = vadd.f32 %v1296_v34, %v1159_v28  ;;  %v867_v29 = vpop.f32.mrf.mxu1  ;;  %v1396_v36 = vpop.eup %1395  ;;  %v931_v34 = vld [vmem:[#allocation4] sm:$0xff]  ;;  %v945_v33 = vadd.f32 %v940_v22, %v933_v51 }
 0x254   :  { %880 = vst.msk [vmem:[#allocation6] sm:$0xff] %vm44_vm0, %v876_v4  ;;  %v1161_v39 = vpop.f32.mrf.mxu0  ;;  %v943_v6 = vadd.f32 %v936_v23, %v931_v34  ;;  %v942_v5 = vmul.f32 0.6931472, %v1396_v36  ;;  %v1398_v28 = vpop.eup %1397 }
 0x255   :  { %v877_v52 = vadd.f32 %v863_v10, %v679_v45  ;;  %v1162_v18 = vadd.f32 %v1161_v39, %v1160_v32 }
 0x256   :  { %v1163_v37 = vpop.f32.mrf.mxu0 }
 0x257   :  { %881 = vst.msk [vmem:[#allocation6 + $0x8] sm:$0xff] %vm44_vm0, %v877_v52  ;;  %v868_v58 = vadd.f32 %v1162_v18, %v867_v29  ;;  %v946_v52 = vadd.f32 %v942_v5, %v934_v19 }
 0x258   :  { %v1164_v42 = vpop.f32.mrf.mxu0 }
 0x259   :  { %v878_v61 = vadd.f32 %v868_v58, %v680_v50  ;;  %v1165_v40 = vadd.f32 %v1164_v42, %v1163_v37 }
 0x25b   :  { %882 = vst.msk [vmem:[#allocation6 + $0x10] sm:$0xff] %vm44_vm0, %v878_v61  ;;  %v873_v17 = vadd.f32 %v1299_v11, %v1165_v40  ;;  %v895_v46 = vld [vmem:[#allocation6] sm:$0xff]  ;;  %v910_v11 = vld [vmem:[#allocation2 + $0x18] sm:$0xff] }
 0x25c   :  { %v903_v56 = vmul.f32 %v1384_v3, %v895_v46  ;;  %v926_v12 = vadd.f32 %v922_v44, %v910_v11  ;;  %v964_v3 = vlaneseq }
 0x25d   :  { %v879_v54 = vadd.f32 %v873_v17, %v681_v59 }
 0x25e   :  { %v896_v7 = vld [vmem:[#allocation6 + $0x8] sm:$0xff]  ;;  %v927_v2 = vadd.f32 %v923_v63, %v903_v56  ;;  %v965_v59 = vshrl.u32 %v964_v3, 7  ;;  %v967_v17 = vand.u32 127, %v964_v3 }
 0x25f   :  { %883 = vst.msk [vmem:[#allocation6 + $0x18] sm:$0xff] %vm44_vm0, %v879_v54  ;;  %v904_v30 = vmul.f32 %v1388_v24, %v896_v7 }
 0x260   :  { %v947_v60 = vsub.f32 %v927_v2, %v943_v6  ;;  %vm968_vm1 = vcmp.eq.s32.totalorder %v965_v59, 0  ;;  %vm969_vm2 = vcmp.eq.s32.totalorder %v967_v17, 0 }
 0x261   :  { %v928_v8 = vadd.f32 %v924_v0, %v904_v30  ;;  %vm970_vm3 = vmand %vm968_vm1, %vm969_vm2 }
 0x262   :  { %v897_v15 = vld [vmem:[#allocation6 + $0x10] sm:$0xff]  ;;  %v951_v18 = vsel %vm44_vm0, %v947_v60, 0.0 }
 0x263   :  { %v905_v38 = vmul.f32 %v1394_v20, %v897_v15  ;;  %v948_v43 = vsub.f32 %v928_v8, %v944_v31 }
 0x265   :  { %v929_v53 = vadd.f32 %v925_v21, %v905_v38  ;;  %v952_v10 = vsel %vm44_vm0, %v948_v43, 0.0 }
 0x266   :  { %v898_v4 = vld [vmem:[#allocation6 + $0x18] sm:$0xff]  ;;  %v953_v37 = vadd.f32 %v952_v10, %v951_v18 }
 0x267   :  { %v906_v32 = vmul.f32 %v1398_v28, %v898_v4  ;;  %v949_v45 = vsub.f32 %v929_v53, %v945_v33 }
 0x269   :  { %v930_v39 = vadd.f32 %v926_v12, %v906_v32  ;;  %v954_v29 = vsel %vm44_vm0, %v949_v45, 0.0 }
 0x26a   :  { %v955_v50 = vadd.f32 %v954_v29, %v953_v37 }
 0x26b   :  { %v950_v41 = vsub.f32 %v930_v39, %v946_v52 }
 0x26d   :  { %v956_v58 = vsel %vm44_vm0, %v950_v41, 0.0 }
 0x26e   :  { %v957_v26 = vadd.f32 %v956_v58, %v955_v50 }
 0x270   :  { %v958_v35 = vrot.slane %v957_v26, 4 }
 0x272   :  { %v959_v42 = vadd.f32 %v958_v35, %v957_v26 }
 0x274   :  { %v960_v47 = vrot.slane %v959_v42, 2 }
 0x276   :  { %v961_v61 = vadd.f32 %v960_v47, %v959_v42 }
 0x278   :  { %v962_v40 = vrot.slane %v961_v61, 1 }
 0x27a   :  { %v963_v48 = vadd.f32 %v962_v40, %v961_v61 }
 0x27c   :  { %973 = vperm.xlu1 %1310, %v963_v48  }
 0x2f7   :  { %v974_v46 = vpop.permute.xlu1 %973 }
 0x2f8   :  { %v976_v55 = vsel %vm970_vm3, %v974_v46, 0.0 }
 0x2f9   :  { %977 = vst [vmem:[#allocation12] sm:$0xff] %v976_v55 }
 0x2fa   :  { %1450 = shalt.err (!%p1447_p0)
}
 0x2fb   :  { %987 = dma.vmem_to_hbm [thread:$0]  %s985_s1, 128, %s2017_s2, [#allocation9]  }
 0x2fc   :  { %1463 = dma.done.wait [#allocation9], 128  }
 0x2fd   :  { %1464 = vsyncadd [#allocation9], 4294967168 }
 0x2fe   :  { %991 = vsyncpa [#allocation8], 1 }
 0x2ff   :  { %992 = vsyncpa [#allocation11], 1 }
 0x300   :  { %993 = vsyncpa [#allocation9], 1 }

</bundles_post_ra>
